<compile_context>
chip_gen: v6e
topology: v6e:2x2x1
jax: 0.10.0
libtpu: 0.0.40
codegen_flags: <defaults>
</compile_context>

<pallas_src>
import math
import functools

import jax
import jax.numpy as jnp
from jax.experimental import pallas as pl
from jax.experimental.pallas import tpu as pltpu


# --------------------------------------------------------------------------------------
# Kernel
# --------------------------------------------------------------------------------------
def _kv_embed_kernel(x_ref, w_ref, b_ref, o_ref, *, scale):
    # w_ref: (3, K, TN) packed [mu, rho, eps] (possibly bf16); b_ref: (3, 1, TN).
    w_mu  = w_ref[0].astype(jnp.float32)
    w_rho = w_ref[1].astype(jnp.float32)
    w_eps = w_ref[2].astype(jnp.float32)
    b_mu  = b_ref[0].astype(jnp.float32)
    b_rho = b_ref[1].astype(jnp.float32)
    b_eps = b_ref[2].astype(jnp.float32)

    # Numerically safe softplus: logaddexp(rho, 0) == log(1 + exp(rho)) without overflow.
    w = w_mu + jnp.logaddexp(w_rho, 0.0) * w_eps                    # (K, TN)
    b_scaled = (b_mu + jnp.logaddexp(b_rho, 0.0) * b_eps) * scale   # (1, TN)

    # Fold sqrt(d_model) into the (tiny) x tile instead of the full output tile.
    xs = x_ref[...].astype(jnp.float32) * scale                     # (B, K)

    y = jnp.dot(xs, w, preferred_element_type=jnp.float32) + b_scaled
    o_ref[...] = y.astype(o_ref.dtype)


# --------------------------------------------------------------------------------------
# Wrapper
# --------------------------------------------------------------------------------------
def pack_bayes_params(w_mu_t, w_rho_t, w_eps_t, b_mu, b_rho, b_eps,
                      dtype=jnp.bfloat16):
    """Pack the Bayesian parameter triplets into single HBM arrays (one DMA per step).

    w_* are the transposed weights, shape (K, N); b_* are (1, N).
    Returns (w_packed: (3, K, N), b_packed: (3, 1, N)) in `dtype`.
    """
    w_packed = jnp.stack([w_mu_t, w_rho_t, w_eps_t], axis=0).astype(dtype)
    b_packed = jnp.stack([b_mu, b_rho, b_eps], axis=0).astype(dtype)
    return w_packed, b_packed


def _vmem_budget_bytes():
    """Conservative VMEM budget that is safe on v5e/v6e (128 MiB) and v7x (64 MiB)."""
    try:
        phys = int(pltpu.get_tpu_info().vmem_capacity_bytes)
    except Exception:
        phys = 64 << 20  # assume the smallest (v7x per-TC) if the query is unavailable
    limit = min(phys * 3 // 4, 96 << 20)   # what we ask the compiler for
    budget = limit * 3 // 4                # what we size tiles against (headroom)
    return limit, budget


def _pick_tile_n(N, K, B, w_itemsize, budget_bytes):
    """Largest lane tile (multiple of 128, divides N) fitting the double-buffered budget."""
    # Per lane-column, double-buffered resident bytes:
    #   weights pack (3, K, t)           -> 3*K*w_itemsize
    #   bias pack    (3, 1->8 pad, t)    -> 3*8*w_itemsize
    #   output       (B->8 pad, t) f32   -> 8*4
    per_lane = 2 * (3 * K * w_itemsize + 3 * 8 * w_itemsize + max(B, 8) * 4)
    cap = max(128, budget_bytes // per_lane)
    cap = (cap // 128) * 128
    if N <= cap:
        return N
    t = cap
    while t >= 128:
        if N % t == 0:
            return t
        t -= 128
    return 128


def key_value_embedding(x, w_packed, b_packed, *, seq_len, d_model, tile_n=None):
    """x: (B, seq_len) f32. w_packed: (3, seq_len, seq_len*d_model). b_packed: (3, 1, N).

    Returns (B, seq_len, d_model) f32.
    """
    B, K = x.shape
    N = seq_len * d_model
    assert K == seq_len
    assert w_packed.shape == (3, K, N)
    assert b_packed.shape == (3, 1, N)
    assert N % 128 == 0, "seq_len * d_model must be a multiple of 128"

    vmem_limit, vmem_budget = _vmem_budget_bytes()
    w_itemsize = jnp.dtype(w_packed.dtype).itemsize
    if tile_n is None:
        tile_n = _pick_tile_n(N, K, B, w_itemsize, vmem_budget)
    assert N % tile_n == 0

    scale = math.sqrt(d_model)
    kernel = functools.partial(_kv_embed_kernel, scale=scale)

    grid = (N // tile_n,)
    x_spec = pl.BlockSpec((B, K), lambda j: (0, 0))
    w_spec = pl.BlockSpec((3, K, tile_n), lambda j: (0, 0, j))
    b_spec = pl.BlockSpec((3, 1, tile_n), lambda j: (0, 0, j))
    o_spec = pl.BlockSpec((B, tile_n), lambda j: (0, j))

    cost = pl.CostEstimate(
        flops=2 * B * K * N + 4 * (K * N + N),          # matmul + sampling elementwise
        transcendentals=2 * (K * N + N),                 # exp + log1p per softplus
        bytes_accessed=x.nbytes + w_packed.nbytes + b_packed.nbytes + B * N * 4,
    )

    out = pl.pallas_call(
        kernel,
        out_shape=jax.ShapeDtypeStruct((B, N), jnp.float32),
        grid_spec=pltpu.PrefetchScalarGridSpec(
            num_scalar_prefetch=0,
            grid=grid,
            in_specs=[x_spec, w_spec, b_spec],
            out_specs=o_spec,
        ),
        compiler_params=pltpu.CompilerParams(
            dimension_semantics=("parallel",),
            vmem_limit_bytes=vmem_limit,
        ),
        cost_estimate=cost,
    )(x, w_packed, b_packed)

    # x.view(-1, seq_len, d_model) — pure reshape glue in the wrapper.
    return out.reshape(B, seq_len, d_model)


# --------------------------------------------------------------------------------------
# Self-test
# --------------------------------------------------------------------------------------
if __name__ == "__main__":
    seq_len = 8
    d_model = 32          # N = seq_len * d_model = 256 (multiple of 128)
    batch = 2
    mu_init = 0.0
    sigma_init = -7.0

    key = jax.random.PRNGKey(0)
    k_x, k_wmu, k_weps, k_bmu, k_beps = jax.random.split(key, 5)

    N = seq_len * d_model
    x = jax.random.normal(k_x, (batch, seq_len), dtype=jnp.float32)

    # Deterministic BayesLinear parameter init (W stored transposed: (in, out)),
    # matching the module: mu ~ N(mu_init, 0.1), rho = sigma_init, eps ~ N(0, 1).
    w_mu_t = mu_init + 0.1 * jax.random.normal(k_wmu, (seq_len, N), dtype=jnp.float32)
    w_rho_t = jnp.full((seq_len, N), sigma_init, dtype=jnp.float32)
    w_eps_t = jax.random.normal(k_weps, (seq_len, N), dtype=jnp.float32)
    b_mu = mu_init + 0.1 * jax.random.normal(k_bmu, (1, N), dtype=jnp.float32)
    b_rho = jnp.full((1, N), sigma_init, dtype=jnp.float32)
    b_eps = jax.random.normal(k_beps, (1, N), dtype=jnp.float32)

    # One-time packing + bf16 storage (halves HBM traffic of the bandwidth-bound kernel).
    w_packed, b_packed = pack_bayes_params(w_mu_t, w_rho_t, w_eps_t,
                                           b_mu, b_rho, b_eps, dtype=jnp.bfloat16)

    out = key_value_embedding(x, w_packed, b_packed, seq_len=seq_len, d_model=d_model)
    out = jax.block_until_ready(out)
    assert out.shape == (batch, seq_len, d_model)

    # Reference 1 (tight): same bf16-stored parameters, upcast to f32, plain JAX math.
    wp = w_packed.astype(jnp.float32)
    bp = b_packed.astype(jnp.float32)
    w_s = wp[0] + jnp.logaddexp(wp[1], 0.0) * wp[2]
    b_s = bp[0] + jnp.logaddexp(bp[1], 0.0) * bp[2]
    ref_bf16 = ((x @ w_s + b_s) * math.sqrt(d_model)).reshape(batch, seq_len, d_model)
    assert jnp.allclose(out, ref_bf16, atol=2e-3, rtol=2e-3), "mismatch vs bf16-param reference"

    # Reference 2 (loose): full-f32 parameters — bounds the bf16 storage error.
    w_f = w_mu_t + jnp.logaddexp(w_rho_t, 0.0) * w_eps_t
    b_f = b_mu + jnp.logaddexp(b_rho, 0.0) * b_eps
    ref_f32 = ((x @ w_f + b_f) * math.sqrt(d_model)).reshape(batch, seq_len, d_model)
    assert jnp.allclose(out, ref_f32, atol=1e-1, rtol=1e-1), "mismatch vs f32 reference"

    print("KERNEL_OK")
</pallas_src>

<mosaic_0001>
module attributes {stable_mosaic.version = 11 : i64} {
  func.func @_kv_embed_kernel(%arg0: i32, %arg1: memref<2x8xf32, #tpu.memory_space<vmem>>, %arg2: memref<3x8x256xbf16, #tpu.memory_space<vmem>>, %arg3: memref<3x1x256xbf16, #tpu.memory_space<vmem>>, %arg4: memref<2x256xf32, #tpu.memory_space<vmem>>) attributes {dimension_semantics = [#tpu.dimension_semantics<parallel>], iteration_bounds = array<i64: 1>, scalar_prefetch = 0 : i64, scratch_operands = 0 : i64, tpu.core_type = #tpu.core_type<tc>, window_params = [{pipeline_mode = #tpu.pipeline_mode<synchronous>, transform_indices = @transform_0, window_bounds = array<i64: 2, 8>}, {transform_indices = @transform_1, window_bounds = array<i64: 3, 8, 256>}, {transform_indices = @transform_2, window_bounds = array<i64: 3, 1, 256>}, {transform_indices = @transform_3, window_bounds = array<i64: 2, 256>}]} {
    %c0 = arith.constant 0 : index
    %c0_0 = arith.constant 0 : index
    %c0_1 = arith.constant 0 : index
    %0 = vector.load %arg2[%c0, %c0_0, %c0_1] : memref<3x8x256xbf16, #tpu.memory_space<vmem>>, vector<1x8x256xbf16>
    %1 = vector.shape_cast %0 : vector<1x8x256xbf16> to vector<8x256xbf16>
    %2 = arith.extf %1 : vector<8x256xbf16> to vector<8x256xf32>
    %c1 = arith.constant 1 : index
    %c0_2 = arith.constant 0 : index
    %c0_3 = arith.constant 0 : index
    %3 = vector.load %arg2[%c1, %c0_2, %c0_3] : memref<3x8x256xbf16, #tpu.memory_space<vmem>>, vector<1x8x256xbf16>
    %4 = vector.shape_cast %3 : vector<1x8x256xbf16> to vector<8x256xbf16>
    %5 = arith.extf %4 : vector<8x256xbf16> to vector<8x256xf32>
    %c2 = arith.constant 2 : index
    %c0_4 = arith.constant 0 : index
    %c0_5 = arith.constant 0 : index
    %6 = vector.load %arg2[%c2, %c0_4, %c0_5] : memref<3x8x256xbf16, #tpu.memory_space<vmem>>, vector<1x8x256xbf16>
    %7 = vector.shape_cast %6 : vector<1x8x256xbf16> to vector<8x256xbf16>
    %8 = arith.extf %7 : vector<8x256xbf16> to vector<8x256xf32>
    %c0_6 = arith.constant 0 : index
    %c0_7 = arith.constant 0 : index
    %c0_8 = arith.constant 0 : index
    %9 = vector.load %arg3[%c0_6, %c0_7, %c0_8] : memref<3x1x256xbf16, #tpu.memory_space<vmem>>, vector<1x1x256xbf16>
    %10 = vector.shape_cast %9 : vector<1x1x256xbf16> to vector<1x256xbf16>
    %11 = arith.extf %10 : vector<1x256xbf16> to vector<1x256xf32>
    %c1_9 = arith.constant 1 : index
    %c0_10 = arith.constant 0 : index
    %c0_11 = arith.constant 0 : index
    %12 = vector.load %arg3[%c1_9, %c0_10, %c0_11] : memref<3x1x256xbf16, #tpu.memory_space<vmem>>, vector<1x1x256xbf16>
    %13 = vector.shape_cast %12 : vector<1x1x256xbf16> to vector<1x256xbf16>
    %14 = arith.extf %13 : vector<1x256xbf16> to vector<1x256xf32>
    %c2_12 = arith.constant 2 : index
    %c0_13 = arith.constant 0 : index
    %c0_14 = arith.constant 0 : index
    %15 = vector.load %arg3[%c2_12, %c0_13, %c0_14] : memref<3x1x256xbf16, #tpu.memory_space<vmem>>, vector<1x1x256xbf16>
    %16 = vector.shape_cast %15 : vector<1x1x256xbf16> to vector<1x256xbf16>
    %17 = arith.extf %16 : vector<1x256xbf16> to vector<1x256xf32>
    %cst = arith.constant 0.000000e+00 : f32
    %18 = vector.broadcast %cst : f32 to vector<8x256xf32>
    %19 = arith.maximumf %5, %18 : vector<8x256xf32>
    %20 = vector.broadcast %cst : f32 to vector<8x256xf32>
    %21 = arith.subf %5, %20 : vector<8x256xf32>
    %22 = arith.cmpf one, %21, %21 : vector<8x256xf32>
    %23 = vector.broadcast %cst : f32 to vector<8x256xf32>
    %24 = arith.addf %5, %23 : vector<8x256xf32>
    %25 = math.absf %21 : vector<8x256xf32>
    %cst_15 = arith.constant 0.000000e+00 : f32
    %26 = vector.broadcast %cst_15 : f32 to vector<8x256xf32>
    %27 = arith.subf %26, %25 : vector<8x256xf32>
    %28 = math.exp %27 : vector<8x256xf32>
    %29 = math.log1p %28 : vector<8x256xf32>
    %30 = arith.addf %19, %29 : vector<8x256xf32>
    %31 = arith.select %22, %24, %30 : vector<8x256xi1>, vector<8x256xf32>
    %32 = arith.mulf %31, %8 : vector<8x256xf32>
    %33 = arith.addf %2, %32 : vector<8x256xf32>
    %cst_16 = arith.constant 0.000000e+00 : f32
    %34 = vector.broadcast %cst_16 : f32 to vector<1x256xf32>
    %35 = arith.maximumf %14, %34 : vector<1x256xf32>
    %36 = vector.broadcast %cst_16 : f32 to vector<1x256xf32>
    %37 = arith.subf %14, %36 : vector<1x256xf32>
    %38 = arith.cmpf one, %37, %37 : vector<1x256xf32>
    %39 = vector.broadcast %cst_16 : f32 to vector<1x256xf32>
    %40 = arith.addf %14, %39 : vector<1x256xf32>
    %41 = math.absf %37 : vector<1x256xf32>
    %cst_17 = arith.constant 0.000000e+00 : f32
    %42 = vector.broadcast %cst_17 : f32 to vector<1x256xf32>
    %43 = arith.subf %42, %41 : vector<1x256xf32>
    %44 = math.exp %43 : vector<1x256xf32>
    %45 = math.log1p %44 : vector<1x256xf32>
    %46 = arith.addf %35, %45 : vector<1x256xf32>
    %47 = arith.select %38, %40, %46 : vector<1x256xi1>, vector<1x256xf32>
    %48 = arith.mulf %47, %17 : vector<1x256xf32>
    %49 = arith.addf %11, %48 : vector<1x256xf32>
    %cst_18 = arith.constant 5.65685415 : f32
    %50 = vector.broadcast %cst_18 : f32 to vector<1x256xf32>
    %51 = arith.mulf %49, %50 : vector<1x256xf32>
    %c0_19 = arith.constant 0 : index
    %c0_20 = arith.constant 0 : index
    %52 = vector.load %arg1[%c0_19, %c0_20] : memref<2x8xf32, #tpu.memory_space<vmem>>, vector<2x8xf32>
    %cst_21 = arith.constant 5.65685415 : f32
    %53 = vector.broadcast %cst_21 : f32 to vector<2x8xf32>
    %54 = arith.mulf %52, %53 : vector<2x8xf32>
    %cst_22 = arith.constant dense<0.000000e+00> : vector<2x256xf32>
    %55 = tpu.matmul %54, %33, %cst_22 {dimension_numbers = #tpu.dot_dimension_numbers<[1], [0], [0], [1], [0, 0, 1, 1], [], []>} : vector<2x8xf32>, vector<8x256xf32>, vector<2x256xf32> -> vector<2x256xf32>
    %56 = vector.broadcast %51 : vector<1x256xf32> to vector<2x256xf32>
    %57 = arith.addf %55, %56 : vector<2x256xf32>
    %c0_23 = arith.constant 0 : index
    %c0_24 = arith.constant 0 : index
    %58 = vector.load %arg4[%c0_23, %c0_24] : memref<2x256xf32, #tpu.memory_space<vmem>>, vector<2x256xf32>
    tpu.vector_store %arg4[%c0_23, %c0_24], %57 {strides = array<i32>} : memref<2x256xf32, #tpu.memory_space<vmem>>, vector<2x256xf32>,
    return
  }
  func.func @transform_0(%arg0: i32) -> (i32, i32) {
    %c0_i32 = arith.constant 0 : i32
    %c0_i32_0 = arith.constant 0 : i32
    %c0_i32_1 = arith.constant 0 : i32
    return %c0_i32, %c0_i32_0 : i32, i32
  }
  func.func @transform_1(%arg0: i32) -> (i32, i32, i32) {
    %c0_i32 = arith.constant 0 : i32
    %c0_i32_0 = arith.constant 0 : i32
    %c0_i32_1 = arith.constant 0 : i32
    return %c0_i32, %c0_i32_0, %arg0 : i32, i32, i32
  }
  func.func @transform_2(%arg0: i32) -> (i32, i32, i32) {
    %c0_i32 = arith.constant 0 : i32
    %c0_i32_0 = arith.constant 0 : i32
    %c0_i32_1 = arith.constant 0 : i32
    return %c0_i32, %c0_i32_0, %arg0 : i32, i32, i32
  }
  func.func @transform_3(%arg0: i32) -> (i32, i32) {
    %c0_i32 = arith.constant 0 : i32
    %c0_i32_0 = arith.constant 0 : i32
    return %c0_i32, %arg0 : i32, i32
  }
}

</mosaic_0001>

<bundles_post_ra>
// kernel: tpu_custom_call.1
= control target key start
LH: loop header
LB: loop body
LE: loop exit
PB: predicated region body
PF: predicated region fallthrough
CT: control target
= control target key end

     0   :  { %8 = vsyncpa [#allocation3], 0  ;;  %s340_s0 = inlined_call_operand.vmem [shape: f32[2,8], index: 0, kind: input, shape index: {}]   ;;  %s341_s1 = inlined_call_operand.hbm [shape: bf16[3,8,256], index: 1, kind: input, shape index: {}]   ;;  %s342_s2 = inlined_call_operand.vmem [shape: bf16[3,1,256], index: 2, kind: input, shape index: {}]   ;;  %s343_s3 = inlined_call_operand.hbm [shape: f32[2,256], index: 3, kind: output, shape index: {}]  }
   0x1   :  { %9 = vsyncpa [#allocation4], 0  ;;  %s297_s12 = smov [#allocation2]  }
   0x2   :  { %s17_s13 = sshll.u32 %s297_s12, 4  ;;  %s18_s13 = int_to_ptr.vmem [resolvable:$true] %s17_s13 }
   0x3   :  { %s261_s14 = scalar_lea.vmem %s18_s13, 384  ;;  %p266_p1 = scmp.lt.s32.totalorder %s18_s13, %s18_s13 }
   0x4   :  { %p262_p0 = scmp.ne.s32.totalorder %s18_s13, %s261_s14  ;;  %p267_p2 = scmp.lt.s32.totalorder %s261_s14, %s261_s14 }
   0x6   :  { %p268_p3 = por %p267_p2, %p266_p1 }
   0x8   :  { %p269_p4 = pnand %p268_p3, %p262_p0 }
   0xa   :  { %272 = shalt.err (!%p269_p4)
}
   0xb   :  { %s298_s15 = smov 128   ;;  %s299_s16 = smov 8  }
   0xc   :  { %23 = dma.hbm_to_vmem [thread:$0]  %s341_s1, 384, %s18_s13, [#allocation3], %s298_s15, %s298_s15, %s299_s16  }
   0xd   :  { %293 = dma.done.wait [#allocation3], 384  }
   0xe   :  { %294 = vsyncadd [#allocation3], 4294966912  ;;  %v300_v0 = vmov 0.0   ;;  %v33_v1 = vld [vmem:[#allocation2 + $0x8] sm:$0xff]  ;;  %v37_v22 = vld [vmem:[#allocation2 + $0x10] sm:$0xff]  ;;  %vm130_vm4 = vcmask 64512  }
   0xf   :  { %198 = vmatprep.mubr.f32.mxu0 %v300_v0  ;;  %v35_v2 = vunpack.c.h.bf16 %v33_v1  ;;  %v34_v3 = vunpack.c.l.bf16 %v33_v1  ;;  %v29_v28 = vld [vmem:[#allocation2] sm:$0xff]  ;;  %v39_v30 = vunpack.c.h.bf16 %v37_v22  ;;  %v38_v33 = vunpack.c.l.bf16 %v37_v22  ;;  %s301_s25 = smov [#allocation5]  }
  0x10   :  { %v31_v35 = vunpack.c.h.bf16 %v29_v28  ;;  %v30_v38 = vunpack.c.l.bf16 %v29_v28  ;;  %v109_v39 = vld [vmem:[%s340_s0] sm:$0x3]  ;;  %v232_v46 = vld [vmem:[%s342_s2 + $0x2] sm:$0x3]  ;;  %v233_v61 = vld [vmem:[%s342_s2 + $0x4] sm:$0x3] }
  0x11   :  { %v55_v4 = vand.u32 2147483647, %v35_v2  ;;  %v54_v5 = vand.u32 2147483647, %v34_v3  ;;  %v49_v23 = vmax.f32 %v35_v2, 0.0  ;;  %v48_v27 = vmax.f32 %v34_v3, 0.0 }
  0x12   :  { %vm51_vm2 = vcmp.ne.f32.partialorder %v35_v2, %v35_v2  ;;  %vm50_vm3 = vcmp.ne.f32.partialorder %v34_v3, %v34_v3  ;;  %v110_v44 = vmul.f32 5.656854, %v109_v39  ;;  %v44_v47 = vunpack.c.l.bf16 %v232_v46  ;;  %v40_v0 = vld [vmem:[%s342_s2] sm:$0x3]  ;;  %s223_s26 = sshll.u32 %s301_s25, 4  ;;  %s224_s26 = int_to_ptr.vmem [resolvable:$true] %s223_s26 }
  0x13   :  { %v57_v6 = vsub.f32 0.0, %v55_v4  ;;  %v56_v7 = vsub.f32 0.0, %v54_v5  ;;  %v47_v63 = vunpack.c.l.bf16 %v233_v61  ;;  %v112_v4 = vlaneseq  ;;  %s273_s2 = scalar_lea.vmem %s224_s26, 64  ;;  %p278_p6 = scmp.lt.s32.totalorder %s224_s26, %s224_s26 }
  0x14   :  { %v91_v48 = vand.u32 2147483647, %v44_v47  ;;  %v88_v59 = vmax.f32 %v44_v47, 0.0  ;;  %vm89_vm6 = vcmp.ne.f32.partialorder %v44_v47, %v44_v47  ;;  %p274_p5 = scmp.ne.s32.totalorder %s224_s26, %s273_s2  ;;  %p279_p7 = scmp.lt.s32.totalorder %s273_s2, %s273_s2 }
  0x15   :  { %v60_v8 = vmul.f32 1.442695, %v57_v6  ;;  %v58_v9 = vmul.f32 1.442695, %v56_v7  ;;  %v113_v6 = vshrl.u32 %v112_v4, 7 }
  0x16   :  { %v92_v49 = vsub.f32 0.0, %v91_v48  ;;  %p280_p8 = por %p279_p7, %p278_p6 }
  0x17   :  { %241 = vpow2.f32 %v60_v8  ;;  %v114_v8 = vsub.s32 0, %v113_v6 }
  0x18   :  { %243 = vpow2.f32 %v58_v9  ;;  %v93_v50 = vmul.f32 1.442695, %v92_v49  ;;  %v118_v9 = vsub.s32 2, %v113_v6  ;;  %p281_p9 = pnand %p280_p8, %p274_p5 }
  0x24   :  { %v242_v10 = vpop.eup %241 }
  0x25   :  { %v244_v11 = vpop.eup %243  ;;  %v71_v12 = vadd.f32 1.0, %v242_v10  ;;  %v74_v14 = vmul.f32 -0.5, %v242_v10  ;;  %v77_v17 = vand.u32 2147483647, %v242_v10 }
  0x26   :  { %v62_v13 = vadd.f32 1.0, %v244_v11  ;;  %v65_v15 = vmul.f32 -0.5, %v244_v11  ;;  %v68_v19 = vand.u32 2147483647, %v244_v11 }
  0x27   :  { %245 = vlog2.f32 %v71_v12  ;;  %v75_v16 = vadd.f32 1.0, %v74_v14  ;;  %vm78_vm0 = vcmp.lt.f32.partialorder %v77_v17, 0.0004427343 }
  0x28   :  { %247 = vlog2.f32 %v62_v13  ;;  %v66_v18 = vadd.f32 1.0, %v65_v15  ;;  %vm69_vm1 = vcmp.lt.f32.partialorder %v68_v19, 0.0004427343 }
  0x29   :  { %v76_v20 = vmul.f32 %v242_v10, %v75_v16  ;;  %249 = vpow2.f32 %v93_v50 }
  0x2a   :  { %v67_v24 = vmul.f32 %v244_v11, %v66_v18 }
  0x34   :  { %v246_v21 = vpop.eup %245 }
  0x35   :  { %v248_v25 = vpop.eup %247  ;;  %v73_v26 = vmul.f32 0.6931472, %v246_v21 }
  0x36   :  { %v64_v29 = vmul.f32 0.6931472, %v248_v25  ;;  %v250_v51 = vpop.eup %249 }
  0x37   :  { %v79_v31 = vsel %vm78_vm0, %v76_v20, %v73_v26  ;;  %v95_v52 = vadd.f32 1.0, %v250_v51  ;;  %v98_v53 = vmul.f32 -0.5, %v250_v51  ;;  %v101_v56 = vand.u32 2147483647, %v250_v51 }
  0x38   :  { %v81_v32 = vadd.f32 %v79_v31, %v49_v23  ;;  %v70_v34 = vsel %vm69_vm1, %v67_v24, %v64_v29 }
  0x39   :  { %v80_v36 = vadd.f32 %v70_v34, %v48_v27  ;;  %251 = vlog2.f32 %v95_v52  ;;  %v99_v54 = vadd.f32 1.0, %v98_v53  ;;  %vm102_vm5 = vcmp.lt.f32.partialorder %v101_v56, 0.0004427343 }
  0x3a   :  { %v83_v37 = vsel %vm51_vm2, %v35_v2, %v81_v32  ;;  %v41_v2 = vunpack.c.l.bf16 %v40_v0 }
  0x3b   :  { %v85_v40 = vmul.f32 %v83_v37, %v39_v30  ;;  %v82_v41 = vsel %vm50_vm3, %v34_v3, %v80_v36  ;;  %v100_v58 = vmul.f32 %v250_v51, %v99_v54 }
  0x3c   :  { %v84_v42 = vmul.f32 %v82_v41, %v38_v33 }
  0x3d   :  { %v87_v43 = vadd.f32 %v85_v40, %v31_v35 }
  0x3e   :  { %v86_v45 = vadd.f32 %v84_v42, %v30_v38 }
  0x3f   :  { %164 = vmatprep.subr.mxu0 %v87_v43 }
  0x40   :  { %165 = vmatpush1.msra.mxu0 %v86_v45 }
  0x41   :  { %234 = vmatmul.mubr.msk.f32.vlgmr.msra.gmra.mxu0 %vm130_vm4, %v110_v44 }
  0x46   :  { %v252_v55 = vpop.eup %251 }
  0x47   :  { %v97_v57 = vmul.f32 0.6931472, %v252_v55 }
  0x49   :  { %v103_v60 = vsel %vm102_vm5, %v100_v58, %v97_v57 }
  0x4a   :  { %v104_v62 = vadd.f32 %v103_v60, %v88_v59 }
  0x4c   :  { %v105_v1 = vsel %vm89_vm6, %v44_v47, %v104_v62 }
  0x4d   :  { %v106_v3 = vmul.f32 %v105_v1, %v47_v63 }
  0x4f   :  { %v107_v5 = vadd.f32 %v106_v3, %v41_v2 }
  0x51   :  { %v108_v7 = vmul.f32 5.656854, %v107_v5 }
  0x53   :  { %v115_v10 = vrot.slane %v108_v7, %v114_v8  ;;  %v119_v11 = vrot.slane %v108_v7, %v118_v9 }
  0x55   :  { %v125_v12 = vrot.slane %v115_v10, %v114_v8  ;;  %v129_v13 = vrot.slane %v119_v11, %v114_v8 }
 0x101   :  { %v200_v14 = vpop.f32.mrf.mxu0 }
 0x102   :  { %v201_v16 = vadd.f32 %v200_v14, %v125_v12 }
 0x103   :  { %v202_v15 = vpop.f32.mrf.mxu0 }
 0x104   :  { %v203_v17 = vadd.f32 %v202_v15, %v129_v13 }
 0x106   :  { %v207_v18 = vcombine.low %v201_v16, %v203_v17 }
 0x108   :  { %235 = vst.sshfl [vmem:[#allocation5] sm:$0x33 pattern:$0x76325410] %v207_v18 }
 0x109   :  { %284 = shalt.err (!%p281_p9)
}
 0x10a   :  { %226 = dma.vmem_to_hbm [thread:$0]  %s224_s26, 64, %s343_s3, [#allocation4]  }
 0x10b   :  { %295 = dma.done.wait [#allocation4], 64  }
 0x10c   :  { %296 = vsyncadd [#allocation4], 4294967232 }
 0x10d   :  { %230 = vsyncpa [#allocation3], 1 }
 0x10e   :  { %231 = vsyncpa [#allocation4], 1 }

</bundles_post_ra>
